<compile_context>
chip_gen: v6e
topology: v6e:2x2x1
jax: 0.10.0
libtpu: 0.0.40
codegen_flags: <defaults>
</compile_context>

<pallas_src>
import functools

import jax
import jax.numpy as jnp
from jax import lax
from jax.experimental import pallas as pl
from jax.experimental.pallas import tpu as pltpu


def stacked_lstm_kernel(x_ref,      # (T, TB, F)  time-major input block, f32
                        wih1e_ref,  # (F, 8H)  layer-1 input proj, fused gate layout, f32
                        bias_ref,   # (1, 8H)  [b1 | b2] interleaved per gate block, f32
                        wbig_ref,   # (2H, 8H) fused recurrent weights, both layers, bf16
                        wl2_ref,    # (2H, 4H) layer-2-only weights for the epilogue, bf16
                        b2_ref,     # (1, 4H)  layer-2 bias (gate-reordered), f32
                        wfc_ref,    # (H, Op)  fc weight, columns zero-padded to Op, bf16
                        bfc_ref,    # (1, Op)  fc bias (padded), f32
                        out_ref):   # (TB, Op) f32
    T, B, F = x_ref.shape
    G = wbig_ref.shape[1]            # 8H
    H2 = G // 4                      # 2H : fused state width [layer1 | layer2]
    H = H2 // 2
    S3 = 3 * H2                      # width of the fused sigmoid block

    # --------- hoisted, loop-invariant work --------------------------------
    wih1e = wih1e_ref[...]
    bias = bias_ref[...]
    wbig = wbig_ref[...]                                        # bf16 operand
    if F == 1:
        # A K=1 MXU matmul is a pointless MXU round-trip: VPU broadcast-mul.
        gadd = x_ref[...] * wih1e + bias                        # (T, B, 8H) f32
    else:
        # General path: contract F with one (loop-invariant) matmul.
        gadd = lax.dot_general(x_ref[...], wih1e,
                               (((2,), (0,)), ((), ()))) + bias
    l1_mask = lax.broadcasted_iota(jnp.int32, (1, H2), 1) < H   # layer-1 lanes

    h = jnp.zeros((B, H2), jnp.float32)            # [h1 | h2]
    c = jnp.zeros((B, H2), jnp.float32)            # [c1 | c2]

    # One fused step: layer-1 at time t and layer-2 at time t-1 (software
    # pipelined), driven by a single bf16 MXU matmul.  Gate layout is
    # [i | f | o | g], so the three sigmoids fuse into one wide EUP call.
    def fused_step(h, c, add, first):
        gates = jnp.dot(h.astype(jnp.bfloat16), wbig,
                        preferred_element_type=jnp.float32) + add
        sig = jax.nn.sigmoid(gates[:, :S3])
        g = jnp.tanh(gates[:, S3:])
        i = sig[:, 0:H2]
        f = sig[:, H2:2 * H2]
        o = sig[:, 2 * H2:S3]
        c_new = f * c + i * g
        h_new = o * jnp.tanh(c_new)
        if first:
            # layer-2 half corresponds to the nonexistent step -1: keep zero.
            c_new = jnp.where(l1_mask, c_new, 0.0)
            h_new = jnp.where(l1_mask, h_new, 0.0)
        return h_new, c_new

    # T is small and static: full Python unroll (LLO scheduler visibility).
    # gadd[t] indexes the leading (page) axis — no sublane shuffles per step.
    for t in range(T):
        h, c = fused_step(h, c, gadd[t], first=(t == 0))

    # --------- epilogue: layer-2 step T-1 with layer-2-only weights --------
    gates2 = jnp.dot(h.astype(jnp.bfloat16), wl2_ref[...],
                     preferred_element_type=jnp.float32) + b2_ref[...]
    sig2 = jax.nn.sigmoid(gates2[:, :3 * H])
    g2 = jnp.tanh(gates2[:, 3 * H:])
    c2 = sig2[:, H:2 * H] * c[:, H:H2] + sig2[:, 0:H] * g2
    h2 = sig2[:, 2 * H:3 * H] * jnp.tanh(c2)

    # fc on the final layer-2 hidden state; output lanes padded to Op (>=128)
    # so the store is an unmasked vst.
    out_ref[...] = (jnp.dot(h2.astype(jnp.bfloat16), wfc_ref[...],
                            preferred_element_type=jnp.float32)
                    + bfc_ref[...])


@functools.partial(jax.jit, static_argnames=("hidden_size", "output_size"))
def stacked_lstm_predictor(x, params, *, hidden_size, output_size):
    """x: (B, T, F) batch-first (PyTorch convention). Returns (B, output_size)."""
    B, T, F = x.shape
    H, O = hidden_size, output_size
    H2, G = 2 * H, 8 * H
    Op = ((O + 127) // 128) * 128            # lane-pad fc output columns

    def reorder(w):
        # (R, 4H) gate blocks [i,f,g,o] (PyTorch) -> [i,f,o,g] (sigmoids first).
        r = w.shape[0]
        w4 = w.reshape(r, 4, H)
        return jnp.concatenate([w4[:, 0], w4[:, 1], w4[:, 3], w4[:, 2]], axis=1)

    def interleave_cols(a, b):
        # a, b: (R, 4H) per-layer gate blocks -> (R, 8H) with columns
        # [i1 i2 | f1 f2 | o1 o2 | g1 g2].
        r = a.shape[0]
        return jnp.stack([a.reshape(r, 4, H), b.reshape(r, 4, H)],
                         axis=2).reshape(r, G)

    wih1 = reorder(params["wih1"])
    whh1 = reorder(params["whh1"])
    wih2 = reorder(params["wih2"])
    whh2 = reorder(params["whh2"])
    b1 = reorder(params["b1"])
    b2 = reorder(params["b2"])

    zeros_h4h = jnp.zeros((H, 4 * H), jnp.float32)
    # Fused recurrent weight (bf16 MXU operand): [h1 | h2] @ wbig -> all gates.
    wbig = interleave_cols(
        jnp.concatenate([whh1, zeros_h4h], axis=0),      # layer-1 gate columns
        jnp.concatenate([wih2, whh2], axis=0),           # layer-2 gate columns
    ).astype(jnp.bfloat16)
    # Layer-1 input projection (zeros for layer-2 blocks) + both biases (f32, VPU path).
    wih1e = interleave_cols(wih1, jnp.zeros((F, 4 * H), jnp.float32))
    bias = interleave_cols(b1, b2)
    # Narrowed layer-2-only weights for the epilogue step.
    wl2 = jnp.concatenate([wih2, whh2], axis=0).astype(jnp.bfloat16)   # (2H, 4H)
    # fc weight/bias, columns zero-padded to Op lanes.
    wfc = jnp.zeros((H, Op), jnp.float32).at[:, :O].set(params["wfc"]).astype(jnp.bfloat16)
    bfc = jnp.zeros((1, Op), jnp.float32).at[:, :O].set(params["bfc"])

    x_tm = jnp.transpose(x, (1, 0, 2))  # time-major for the kernel: (T, B, F)

    # Batch-blocked grid: only helps throughput (extra MXU rows / second v7x
    # TensorCore) when many independent sequences are batched; at B=2 it
    # degenerates to grid=(1,) and the kernel is per-step latency-bound.
    TB = 8 if (B > 8 and B % 8 == 0) else B
    grid = (B // TB,)

    out = pl.pallas_call(
        stacked_lstm_kernel,
        out_shape=jax.ShapeDtypeStruct((B, Op), jnp.float32),
        grid=grid,
        in_specs=[
            pl.BlockSpec((T, TB, F), lambda b: (0, b, 0)),
            pl.BlockSpec((F, G), lambda b: (0, 0)),
            pl.BlockSpec((1, G), lambda b: (0, 0)),
            pl.BlockSpec((H2, G), lambda b: (0, 0)),
            pl.BlockSpec((H2, 4 * H), lambda b: (0, 0)),
            pl.BlockSpec((1, 4 * H), lambda b: (0, 0)),
            pl.BlockSpec((H, Op), lambda b: (0, 0)),
            pl.BlockSpec((1, Op), lambda b: (0, 0)),
        ],
        out_specs=pl.BlockSpec((TB, Op), lambda b: (b, 0)),
        compiler_params=pltpu.CompilerParams(
            dimension_semantics=("parallel",)),
    )(x_tm, wih1e, bias, wbig, wl2, b2, wfc, bfc)
    return out[:, :O]


def init_params(key, F, H, O):
    """Deterministic synthetic weights, PyTorch-style uniform(-1/sqrt(H), 1/sqrt(H)).
    Stored pre-transposed for `x @ W` use; ih/hh biases are pre-summed."""
    ks = jax.random.split(key, 10)
    s = 1.0 / jnp.sqrt(H)

    def u(k, shape):
        return jax.random.uniform(k, shape, jnp.float32, -s, s)

    # lstm1: weight_ih (4H,F), weight_hh (4H,H), bias_ih (4H,), bias_hh (4H,)
    wih1 = u(ks[0], (4 * H, F)).T            # (F, 4H)
    whh1 = u(ks[1], (4 * H, H)).T            # (H, 4H)
    b1 = (u(ks[2], (4 * H,)) + u(ks[3], (4 * H,))).reshape(1, 4 * H)
    # lstm2
    wih2 = u(ks[4], (4 * H, H)).T            # (H, 4H)
    whh2 = u(ks[5], (4 * H, H)).T            # (H, 4H)
    b2 = (u(ks[6], (4 * H,)) + u(ks[7], (4 * H,))).reshape(1, 4 * H)
    # fc: weight (O,H), bias (O,)
    wfc = u(ks[8], (O, H)).T                 # (H, O)
    bfc = u(ks[9], (O,)).reshape(1, O)
    return dict(wih1=wih1, whh1=whh1, b1=b1,
                wih2=wih2, whh2=whh2, b2=b2,
                wfc=wfc, bfc=bfc)


def reference_forward(x, params, H):
    """Pure-JAX f32 reference (identical math to the PyTorch module)."""
    B = x.shape[0]

    def cell(carry, x_t, wih, whh, b):
        h, c = carry
        gates = x_t @ wih + h @ whh + b
        i = jax.nn.sigmoid(gates[:, 0 * H:1 * H])
        f = jax.nn.sigmoid(gates[:, 1 * H:2 * H])
        g = jnp.tanh(gates[:, 2 * H:3 * H])
        o = jax.nn.sigmoid(gates[:, 3 * H:4 * H])
        c = f * c + i * g
        h = o * jnp.tanh(c)
        return (h, c), h

    def run_layer(xs, wih, whh, b):
        init = (jnp.zeros((B, H), jnp.float32), jnp.zeros((B, H), jnp.float32))
        _, hs = lax.scan(lambda carry, x_t: cell(carry, x_t, wih, whh, b),
                         init, jnp.transpose(xs, (1, 0, 2)))
        return jnp.transpose(hs, (1, 0, 2))

    h1 = run_layer(x, params["wih1"], params["whh1"], params["b1"])
    h2 = run_layer(h1, params["wih2"], params["whh2"], params["b2"])
    return h2[:, -1, :] @ params["wfc"] + params["bfc"]


if __name__ == "__main__":
    # Small shapes consistent with the module: features=[0] -> F=1
    B, T, F = 2, 8, 1
    H, O = 32, 96  # hidden_size, output_size (24*4-style)

    key = jax.random.PRNGKey(0)
    k_x, k_p = jax.random.split(key)
    x = jax.random.normal(k_x, (B, T, F), jnp.float32)
    params = init_params(k_p, F, H, O)

    out = stacked_lstm_predictor(x, params, hidden_size=H, output_size=O)
    out = jax.block_until_ready(out)

    ref = reference_forward(x, params, H)
    assert out.shape == (B, O)
    # bf16 MXU operands (weights + h at the dot) bound the agreement with the
    # pure-f32 reference to ~1e-3..1e-2 absolute; state/elementwise math is f32.
    assert jnp.allclose(out, ref, atol=2e-2, rtol=2e-2), (
        f"mismatch: max abs err {jnp.max(jnp.abs(out - ref))}")

    print("KERNEL_OK")
</pallas_src>

<mosaic_0001>
module attributes {stable_mosaic.version = 11 : i64} {
  func.func @stacked_lstm_kernel(%arg0: i32, %arg1: memref<8x2x1xf32, #tpu.memory_space<vmem>>, %arg2: memref<1x256xf32, #tpu.memory_space<vmem>>, %arg3: memref<1x256xf32, #tpu.memory_space<vmem>>, %arg4: memref<64x256xbf16, #tpu.memory_space<vmem>>, %arg5: memref<64x128xbf16, #tpu.memory_space<vmem>>, %arg6: memref<1x128xf32, #tpu.memory_space<vmem>>, %arg7: memref<32x128xbf16, #tpu.memory_space<vmem>>, %arg8: memref<1x128xf32, #tpu.memory_space<vmem>>, %arg9: memref<2x128xf32, #tpu.memory_space<vmem>>) attributes {dimension_semantics = [#tpu.dimension_semantics<parallel>], iteration_bounds = array<i64: 1>, scalar_prefetch = 0 : i64, scratch_operands = 0 : i64, tpu.core_type = #tpu.core_type<tc>, window_params = [{transform_indices = @transform_0, window_bounds = array<i64: 8, 2, 1>}, {pipeline_mode = #tpu.pipeline_mode<synchronous>, transform_indices = @transform_1, window_bounds = array<i64: 1, 256>}, {pipeline_mode = #tpu.pipeline_mode<synchronous>, transform_indices = @transform_2, window_bounds = array<i64: 1, 256>}, {pipeline_mode = #tpu.pipeline_mode<synchronous>, transform_indices = @transform_3, window_bounds = array<i64: 64, 256>}, {pipeline_mode = #tpu.pipeline_mode<synchronous>, transform_indices = @transform_4, window_bounds = array<i64: 64, 128>}, {pipeline_mode = #tpu.pipeline_mode<synchronous>, transform_indices = @transform_5, window_bounds = array<i64: 1, 128>}, {pipeline_mode = #tpu.pipeline_mode<synchronous>, transform_indices = @transform_6, window_bounds = array<i64: 32, 128>}, {pipeline_mode = #tpu.pipeline_mode<synchronous>, transform_indices = @transform_7, window_bounds = array<i64: 1, 128>}, {transform_indices = @transform_8, window_bounds = array<i64: 2, 128>}]} {
    %c0 = arith.constant 0 : index
    %c0_0 = arith.constant 0 : index
    %0 = vector.load %arg2[%c0, %c0_0] : memref<1x256xf32, #tpu.memory_space<vmem>>, vector<1x256xf32>
    %c0_1 = arith.constant 0 : index
    %c0_2 = arith.constant 0 : index
    %1 = vector.load %arg3[%c0_1, %c0_2] : memref<1x256xf32, #tpu.memory_space<vmem>>, vector<1x256xf32>
    %c0_3 = arith.constant 0 : index
    %c0_4 = arith.constant 0 : index
    %2 = vector.load %arg4[%c0_3, %c0_4] : memref<64x256xbf16, #tpu.memory_space<vmem>>, vector<64x256xbf16>
    %c0_5 = arith.constant 0 : index
    %c0_6 = arith.constant 0 : index
    %c0_7 = arith.constant 0 : index
    %3 = vector.load %arg1[%c0_5, %c0_6, %c0_7] : memref<8x2x1xf32, #tpu.memory_space<vmem>>, vector<8x2x1xf32>
    %4 = vector.shape_cast %0 : vector<1x256xf32> to vector<1x1x256xf32>
    %5 = vector.broadcast %3 : vector<8x2x1xf32> to vector<8x2x256xf32>
    %6 = vector.broadcast %4 : vector<1x1x256xf32> to vector<8x2x256xf32>
    %7 = arith.mulf %5, %6 : vector<8x2x256xf32>
    %8 = vector.shape_cast %1 : vector<1x256xf32> to vector<1x1x256xf32>
    %9 = vector.broadcast %8 : vector<1x1x256xf32> to vector<8x2x256xf32>
    %10 = arith.addf %7, %9 : vector<8x2x256xf32>
    %11 = tpu.iota {dimensions = array<i32: 1>} : vector<1x64xi32>
    %c32_i32 = arith.constant 32 : i32
    %12 = vector.broadcast %c32_i32 : i32 to vector<1x64xi32>
    %13 = arith.cmpi slt, %11, %12 : vector<1x64xi32>
    %cst = arith.constant 0.000000e+00 : f32
    %14 = vector.broadcast %cst : f32 to vector<2x64xf32>
    %cst_8 = arith.constant 0.000000e+00 : f32
    %15 = vector.broadcast %cst_8 : f32 to vector<2x64xf32>
    %16 = vector.extract_strided_slice %10 {offsets = [0, 0, 0], sizes = [1, 2, 256], strides = [1, 1, 1]} : vector<8x2x256xf32> to vector<1x2x256xf32>
    %17 = vector.shape_cast %16 : vector<1x2x256xf32> to vector<2x256xf32>
    %18 = arith.truncf %14 : vector<2x64xf32> to vector<2x64xbf16>
    %cst_9 = arith.constant dense<0.000000e+00> : vector<2x256xf32>
    %19 = tpu.matmul %18, %2, %cst_9 {dimension_numbers = #tpu.dot_dimension_numbers<[1], [0], [0], [1], [0, 0, 1, 1], [], []>} : vector<2x64xbf16>, vector<64x256xbf16>, vector<2x256xf32> -> vector<2x256xf32>
    %20 = arith.addf %19, %17 : vector<2x256xf32>
    %21 = vector.extract_strided_slice %20 {offsets = [0, 0], sizes = [2, 192], strides = [1, 1]} : vector<2x256xf32> to vector<2x192xf32>
    %22 = arith.negf %21 : vector<2x192xf32>
    %23 = math.exp %22 : vector<2x192xf32>
    %cst_10 = arith.constant 1.000000e+00 : f32
    %24 = vector.broadcast %cst_10 : f32 to vector<2x192xf32>
    %25 = arith.addf %24, %23 : vector<2x192xf32>
    %26 = arith.divf %24, %25 : vector<2x192xf32>
    %27 = vector.extract_strided_slice %20 {offsets = [0, 192], sizes = [2, 64], strides = [1, 1]} : vector<2x256xf32> to vector<2x64xf32>
    %28 = math.tanh %27 : vector<2x64xf32>
    %29 = vector.extract_strided_slice %26 {offsets = [0, 0], sizes = [2, 64], strides = [1, 1]} : vector<2x192xf32> to vector<2x64xf32>
    %30 = vector.extract_strided_slice %26 {offsets = [0, 64], sizes = [2, 64], strides = [1, 1]} : vector<2x192xf32> to vector<2x64xf32>
    %31 = vector.extract_strided_slice %26 {offsets = [0, 128], sizes = [2, 64], strides = [1, 1]} : vector<2x192xf32> to vector<2x64xf32>
    %32 = arith.mulf %30, %15 : vector<2x64xf32>
    %33 = arith.mulf %29, %28 : vector<2x64xf32>
    %34 = arith.addf %32, %33 : vector<2x64xf32>
    %35 = math.tanh %34 : vector<2x64xf32>
    %36 = arith.mulf %31, %35 : vector<2x64xf32>
    %cst_11 = arith.constant 0.000000e+00 : f32
    %37 = vector.shape_cast %13 : vector<1x64xi1> to vector<1x64xi1>
    %38 = vector.broadcast %37 : vector<1x64xi1> to vector<2x64xi1>
    %39 = vector.broadcast %cst_11 : f32 to vector<2x64xf32>
    %40 = arith.select %38, %34, %39 : vector<2x64xi1>, vector<2x64xf32>
    %cst_12 = arith.constant 0.000000e+00 : f32
    %41 = vector.shape_cast %13 : vector<1x64xi1> to vector<1x64xi1>
    %42 = vector.broadcast %41 : vector<1x64xi1> to vector<2x64xi1>
    %43 = vector.broadcast %cst_12 : f32 to vector<2x64xf32>
    %44 = arith.select %42, %36, %43 : vector<2x64xi1>, vector<2x64xf32>
    %45 = vector.extract_strided_slice %10 {offsets = [1, 0, 0], sizes = [1, 2, 256], strides = [1, 1, 1]} : vector<8x2x256xf32> to vector<1x2x256xf32>
    %46 = vector.shape_cast %45 : vector<1x2x256xf32> to vector<2x256xf32>
    %47 = arith.truncf %44 : vector<2x64xf32> to vector<2x64xbf16>
    %cst_13 = arith.constant dense<0.000000e+00> : vector<2x256xf32>
    %48 = tpu.matmul %47, %2, %cst_13 {dimension_numbers = #tpu.dot_dimension_numbers<[1], [0], [0], [1], [0, 0, 1, 1], [], []>} : vector<2x64xbf16>, vector<64x256xbf16>, vector<2x256xf32> -> vector<2x256xf32>
    %49 = arith.addf %48, %46 : vector<2x256xf32>
    %50 = vector.extract_strided_slice %49 {offsets = [0, 0], sizes = [2, 192], strides = [1, 1]} : vector<2x256xf32> to vector<2x192xf32>
    %51 = arith.negf %50 : vector<2x192xf32>
    %52 = math.exp %51 : vector<2x192xf32>
    %cst_14 = arith.constant 1.000000e+00 : f32
    %53 = vector.broadcast %cst_14 : f32 to vector<2x192xf32>
    %54 = arith.addf %53, %52 : vector<2x192xf32>
    %55 = arith.divf %53, %54 : vector<2x192xf32>
    %56 = vector.extract_strided_slice %49 {offsets = [0, 192], sizes = [2, 64], strides = [1, 1]} : vector<2x256xf32> to vector<2x64xf32>
    %57 = math.tanh %56 : vector<2x64xf32>
    %58 = vector.extract_strided_slice %55 {offsets = [0, 0], sizes = [2, 64], strides = [1, 1]} : vector<2x192xf32> to vector<2x64xf32>
    %59 = vector.extract_strided_slice %55 {offsets = [0, 64], sizes = [2, 64], strides = [1, 1]} : vector<2x192xf32> to vector<2x64xf32>
    %60 = vector.extract_strided_slice %55 {offsets = [0, 128], sizes = [2, 64], strides = [1, 1]} : vector<2x192xf32> to vector<2x64xf32>
    %61 = arith.mulf %59, %40 : vector<2x64xf32>
    %62 = arith.mulf %58, %57 : vector<2x64xf32>
    %63 = arith.addf %61, %62 : vector<2x64xf32>
    %64 = math.tanh %63 : vector<2x64xf32>
    %65 = arith.mulf %60, %64 : vector<2x64xf32>
    %66 = vector.extract_strided_slice %10 {offsets = [2, 0, 0], sizes = [1, 2, 256], strides = [1, 1, 1]} : vector<8x2x256xf32> to vector<1x2x256xf32>
    %67 = vector.shape_cast %66 : vector<1x2x256xf32> to vector<2x256xf32>
    %68 = arith.truncf %65 : vector<2x64xf32> to vector<2x64xbf16>
    %cst_15 = arith.constant dense<0.000000e+00> : vector<2x256xf32>
    %69 = tpu.matmul %68, %2, %cst_15 {dimension_numbers = #tpu.dot_dimension_numbers<[1], [0], [0], [1], [0, 0, 1, 1], [], []>} : vector<2x64xbf16>, vector<64x256xbf16>, vector<2x256xf32> -> vector<2x256xf32>
    %70 = arith.addf %69, %67 : vector<2x256xf32>
    %71 = vector.extract_strided_slice %70 {offsets = [0, 0], sizes = [2, 192], strides = [1, 1]} : vector<2x256xf32> to vector<2x192xf32>
    %72 = arith.negf %71 : vector<2x192xf32>
    %73 = math.exp %72 : vector<2x192xf32>
    %cst_16 = arith.constant 1.000000e+00 : f32
    %74 = vector.broadcast %cst_16 : f32 to vector<2x192xf32>
    %75 = arith.addf %74, %73 : vector<2x192xf32>
    %76 = arith.divf %74, %75 : vector<2x192xf32>
    %77 = vector.extract_strided_slice %70 {offsets = [0, 192], sizes = [2, 64], strides = [1, 1]} : vector<2x256xf32> to vector<2x64xf32>
    %78 = math.tanh %77 : vector<2x64xf32>
    %79 = vector.extract_strided_slice %76 {offsets = [0, 0], sizes = [2, 64], strides = [1, 1]} : vector<2x192xf32> to vector<2x64xf32>
    %80 = vector.extract_strided_slice %76 {offsets = [0, 64], sizes = [2, 64], strides = [1, 1]} : vector<2x192xf32> to vector<2x64xf32>
    %81 = vector.extract_strided_slice %76 {offsets = [0, 128], sizes = [2, 64], strides = [1, 1]} : vector<2x192xf32> to vector<2x64xf32>
    %82 = arith.mulf %80, %63 : vector<2x64xf32>
    %83 = arith.mulf %79, %78 : vector<2x64xf32>
    %84 = arith.addf %82, %83 : vector<2x64xf32>
    %85 = math.tanh %84 : vector<2x64xf32>
    %86 = arith.mulf %81, %85 : vector<2x64xf32>
    %87 = vector.extract_strided_slice %10 {offsets = [3, 0, 0], sizes = [1, 2, 256], strides = [1, 1, 1]} : vector<8x2x256xf32> to vector<1x2x256xf32>
    %88 = vector.shape_cast %87 : vector<1x2x256xf32> to vector<2x256xf32>
    %89 = arith.truncf %86 : vector<2x64xf32> to vector<2x64xbf16>
    %cst_17 = arith.constant dense<0.000000e+00> : vector<2x256xf32>
    %90 = tpu.matmul %89, %2, %cst_17 {dimension_numbers = #tpu.dot_dimension_numbers<[1], [0], [0], [1], [0, 0, 1, 1], [], []>} : vector<2x64xbf16>, vector<64x256xbf16>, vector<2x256xf32> -> vector<2x256xf32>
    %91 = arith.addf %90, %88 : vector<2x256xf32>
    %92 = vector.extract_strided_slice %91 {offsets = [0, 0], sizes = [2, 192], strides = [1, 1]} : vector<2x256xf32> to vector<2x192xf32>
    %93 = arith.negf %92 : vector<2x192xf32>
    %94 = math.exp %93 : vector<2x192xf32>
    %cst_18 = arith.constant 1.000000e+00 : f32
    %95 = vector.broadcast %cst_18 : f32 to vector<2x192xf32>
    %96 = arith.addf %95, %94 : vector<2x192xf32>
    %97 = arith.divf %95, %96 : vector<2x192xf32>
    %98 = vector.extract_strided_slice %91 {offsets = [0, 192], sizes = [2, 64], strides = [1, 1]} : vector<2x256xf32> to vector<2x64xf32>
    %99 = math.tanh %98 : vector<2x64xf32>
    %100 = vector.extract_strided_slice %97 {offsets = [0, 0], sizes = [2, 64], strides = [1, 1]} : vector<2x192xf32> to vector<2x64xf32>
    %101 = vector.extract_strided_slice %97 {offsets = [0, 64], sizes = [2, 64], strides = [1, 1]} : vector<2x192xf32> to vector<2x64xf32>
    %102 = vector.extract_strided_slice %97 {offsets = [0, 128], sizes = [2, 64], strides = [1, 1]} : vector<2x192xf32> to vector<2x64xf32>
    %103 = arith.mulf %101, %84 : vector<2x64xf32>
    %104 = arith.mulf %100, %99 : vector<2x64xf32>
    %105 = arith.addf %103, %104 : vector<2x64xf32>
    %106 = math.tanh %105 : vector<2x64xf32>
    %107 = arith.mulf %102, %106 : vector<2x64xf32>
    %108 = vector.extract_strided_slice %10 {offsets = [4, 0, 0], sizes = [1, 2, 256], strides = [1, 1, 1]} : vector<8x2x256xf32> to vector<1x2x256xf32>
    %109 = vector.shape_cast %108 : vector<1x2x256xf32> to vector<2x256xf32>
    %110 = arith.truncf %107 : vector<2x64xf32> to vector<2x64xbf16>
    %cst_19 = arith.constant dense<0.000000e+00> : vector<2x256xf32>
    %111 = tpu.matmul %110, %2, %cst_19 {dimension_numbers = #tpu.dot_dimension_numbers<[1], [0], [0], [1], [0, 0, 1, 1], [], []>} : vector<2x64xbf16>, vector<64x256xbf16>, vector<2x256xf32> -> vector<2x256xf32>
    %112 = arith.addf %111, %109 : vector<2x256xf32>
    %113 = vector.extract_strided_slice %112 {offsets = [0, 0], sizes = [2, 192], strides = [1, 1]} : vector<2x256xf32> to vector<2x192xf32>
    %114 = arith.negf %113 : vector<2x192xf32>
    %115 = math.exp %114 : vector<2x192xf32>
    %cst_20 = arith.constant 1.000000e+00 : f32
    %116 = vector.broadcast %cst_20 : f32 to vector<2x192xf32>
    %117 = arith.addf %116, %115 : vector<2x192xf32>
    %118 = arith.divf %116, %117 : vector<2x192xf32>
    %119 = vector.extract_strided_slice %112 {offsets = [0, 192], sizes = [2, 64], strides = [1, 1]} : vector<2x256xf32> to vector<2x64xf32>
    %120 = math.tanh %119 : vector<2x64xf32>
    %121 = vector.extract_strided_slice %118 {offsets = [0, 0], sizes = [2, 64], strides = [1, 1]} : vector<2x192xf32> to vector<2x64xf32>
    %122 = vector.extract_strided_slice %118 {offsets = [0, 64], sizes = [2, 64], strides = [1, 1]} : vector<2x192xf32> to vector<2x64xf32>
    %123 = vector.extract_strided_slice %118 {offsets = [0, 128], sizes = [2, 64], strides = [1, 1]} : vector<2x192xf32> to vector<2x64xf32>
    %124 = arith.mulf %122, %105 : vector<2x64xf32>
    %125 = arith.mulf %121, %120 : vector<2x64xf32>
    %126 = arith.addf %124, %125 : vector<2x64xf32>
    %127 = math.tanh %126 : vector<2x64xf32>
    %128 = arith.mulf %123, %127 : vector<2x64xf32>
    %129 = vector.extract_strided_slice %10 {offsets = [5, 0, 0], sizes = [1, 2, 256], strides = [1, 1, 1]} : vector<8x2x256xf32> to vector<1x2x256xf32>
    %130 = vector.shape_cast %129 : vector<1x2x256xf32> to vector<2x256xf32>
    %131 = arith.truncf %128 : vector<2x64xf32> to vector<2x64xbf16>
    %cst_21 = arith.constant dense<0.000000e+00> : vector<2x256xf32>
    %132 = tpu.matmul %131, %2, %cst_21 {dimension_numbers = #tpu.dot_dimension_numbers<[1], [0], [0], [1], [0, 0, 1, 1], [], []>} : vector<2x64xbf16>, vector<64x256xbf16>, vector<2x256xf32> -> vector<2x256xf32>
    %133 = arith.addf %132, %130 : vector<2x256xf32>
    %134 = vector.extract_strided_slice %133 {offsets = [0, 0], sizes = [2, 192], strides = [1, 1]} : vector<2x256xf32> to vector<2x192xf32>
    %135 = arith.negf %134 : vector<2x192xf32>
    %136 = math.exp %135 : vector<2x192xf32>
    %cst_22 = arith.constant 1.000000e+00 : f32
    %137 = vector.broadcast %cst_22 : f32 to vector<2x192xf32>
    %138 = arith.addf %137, %136 : vector<2x192xf32>
    %139 = arith.divf %137, %138 : vector<2x192xf32>
    %140 = vector.extract_strided_slice %133 {offsets = [0, 192], sizes = [2, 64], strides = [1, 1]} : vector<2x256xf32> to vector<2x64xf32>
    %141 = math.tanh %140 : vector<2x64xf32>
    %142 = vector.extract_strided_slice %139 {offsets = [0, 0], sizes = [2, 64], strides = [1, 1]} : vector<2x192xf32> to vector<2x64xf32>
    %143 = vector.extract_strided_slice %139 {offsets = [0, 64], sizes = [2, 64], strides = [1, 1]} : vector<2x192xf32> to vector<2x64xf32>
    %144 = vector.extract_strided_slice %139 {offsets = [0, 128], sizes = [2, 64], strides = [1, 1]} : vector<2x192xf32> to vector<2x64xf32>
    %145 = arith.mulf %143, %126 : vector<2x64xf32>
    %146 = arith.mulf %142, %141 : vector<2x64xf32>
    %147 = arith.addf %145, %146 : vector<2x64xf32>
    %148 = math.tanh %147 : vector<2x64xf32>
    %149 = arith.mulf %144, %148 : vector<2x64xf32>
    %150 = vector.extract_strided_slice %10 {offsets = [6, 0, 0], sizes = [1, 2, 256], strides = [1, 1, 1]} : vector<8x2x256xf32> to vector<1x2x256xf32>
    %151 = vector.shape_cast %150 : vector<1x2x256xf32> to vector<2x256xf32>
    %152 = arith.truncf %149 : vector<2x64xf32> to vector<2x64xbf16>
    %cst_23 = arith.constant dense<0.000000e+00> : vector<2x256xf32>
    %153 = tpu.matmul %152, %2, %cst_23 {dimension_numbers = #tpu.dot_dimension_numbers<[1], [0], [0], [1], [0, 0, 1, 1], [], []>} : vector<2x64xbf16>, vector<64x256xbf16>, vector<2x256xf32> -> vector<2x256xf32>
    %154 = arith.addf %153, %151 : vector<2x256xf32>
    %155 = vector.extract_strided_slice %154 {offsets = [0, 0], sizes = [2, 192], strides = [1, 1]} : vector<2x256xf32> to vector<2x192xf32>
    %156 = arith.negf %155 : vector<2x192xf32>
    %157 = math.exp %156 : vector<2x192xf32>
    %cst_24 = arith.constant 1.000000e+00 : f32
    %158 = vector.broadcast %cst_24 : f32 to vector<2x192xf32>
    %159 = arith.addf %158, %157 : vector<2x192xf32>
    %160 = arith.divf %158, %159 : vector<2x192xf32>
    %161 = vector.extract_strided_slice %154 {offsets = [0, 192], sizes = [2, 64], strides = [1, 1]} : vector<2x256xf32> to vector<2x64xf32>
    %162 = math.tanh %161 : vector<2x64xf32>
    %163 = vector.extract_strided_slice %160 {offsets = [0, 0], sizes = [2, 64], strides = [1, 1]} : vector<2x192xf32> to vector<2x64xf32>
    %164 = vector.extract_strided_slice %160 {offsets = [0, 64], sizes = [2, 64], strides = [1, 1]} : vector<2x192xf32> to vector<2x64xf32>
    %165 = vector.extract_strided_slice %160 {offsets = [0, 128], sizes = [2, 64], strides = [1, 1]} : vector<2x192xf32> to vector<2x64xf32>
    %166 = arith.mulf %164, %147 : vector<2x64xf32>
    %167 = arith.mulf %163, %162 : vector<2x64xf32>
    %168 = arith.addf %166, %167 : vector<2x64xf32>
    %169 = math.tanh %168 : vector<2x64xf32>
    %170 = arith.mulf %165, %169 : vector<2x64xf32>
    %171 = vector.extract_strided_slice %10 {offsets = [7, 0, 0], sizes = [1, 2, 256], strides = [1, 1, 1]} : vector<8x2x256xf32> to vector<1x2x256xf32>
    %172 = vector.shape_cast %171 : vector<1x2x256xf32> to vector<2x256xf32>
    %173 = arith.truncf %170 : vector<2x64xf32> to vector<2x64xbf16>
    %cst_25 = arith.constant dense<0.000000e+00> : vector<2x256xf32>
    %174 = tpu.matmul %173, %2, %cst_25 {dimension_numbers = #tpu.dot_dimension_numbers<[1], [0], [0], [1], [0, 0, 1, 1], [], []>} : vector<2x64xbf16>, vector<64x256xbf16>, vector<2x256xf32> -> vector<2x256xf32>
    %175 = arith.addf %174, %172 : vector<2x256xf32>
    %176 = vector.extract_strided_slice %175 {offsets = [0, 0], sizes = [2, 192], strides = [1, 1]} : vector<2x256xf32> to vector<2x192xf32>
    %177 = arith.negf %176 : vector<2x192xf32>
    %178 = math.exp %177 : vector<2x192xf32>
    %cst_26 = arith.constant 1.000000e+00 : f32
    %179 = vector.broadcast %cst_26 : f32 to vector<2x192xf32>
    %180 = arith.addf %179, %178 : vector<2x192xf32>
    %181 = arith.divf %179, %180 : vector<2x192xf32>
    %182 = vector.extract_strided_slice %175 {offsets = [0, 192], sizes = [2, 64], strides = [1, 1]} : vector<2x256xf32> to vector<2x64xf32>
    %183 = math.tanh %182 : vector<2x64xf32>
    %184 = vector.extract_strided_slice %181 {offsets = [0, 0], sizes = [2, 64], strides = [1, 1]} : vector<2x192xf32> to vector<2x64xf32>
    %185 = vector.extract_strided_slice %181 {offsets = [0, 64], sizes = [2, 64], strides = [1, 1]} : vector<2x192xf32> to vector<2x64xf32>
    %186 = vector.extract_strided_slice %181 {offsets = [0, 128], sizes = [2, 64], strides = [1, 1]} : vector<2x192xf32> to vector<2x64xf32>
    %187 = arith.mulf %185, %168 : vector<2x64xf32>
    %188 = arith.mulf %184, %183 : vector<2x64xf32>
    %189 = arith.addf %187, %188 : vector<2x64xf32>
    %190 = math.tanh %189 : vector<2x64xf32>
    %191 = arith.mulf %186, %190 : vector<2x64xf32>
    %192 = arith.truncf %191 : vector<2x64xf32> to vector<2x64xbf16>
    %c0_27 = arith.constant 0 : index
    %c0_28 = arith.constant 0 : index
    %193 = vector.load %arg5[%c0_27, %c0_28] : memref<64x128xbf16, #tpu.memory_space<vmem>>, vector<64x128xbf16>
    %cst_29 = arith.constant dense<0.000000e+00> : vector<2x128xf32>
    %194 = tpu.matmul %192, %193, %cst_29 {dimension_numbers = #tpu.dot_dimension_numbers<[1], [0], [0], [1], [0, 0, 1, 1], [], []>} : vector<2x64xbf16>, vector<64x128xbf16>, vector<2x128xf32> -> vector<2x128xf32>
    %c0_30 = arith.constant 0 : index
    %c0_31 = arith.constant 0 : index
    %195 = vector.load %arg6[%c0_30, %c0_31] : memref<1x128xf32, #tpu.memory_space<vmem>>, vector<1x128xf32>
    %196 = vector.broadcast %195 : vector<1x128xf32> to vector<2x128xf32>
    %197 = arith.addf %194, %196 : vector<2x128xf32>
    %198 = vector.extract_strided_slice %197 {offsets = [0, 0], sizes = [2, 96], strides = [1, 1]} : vector<2x128xf32> to vector<2x96xf32>
    %199 = arith.negf %198 : vector<2x96xf32>
    %200 = math.exp %199 : vector<2x96xf32>
    %cst_32 = arith.constant 1.000000e+00 : f32
    %201 = vector.broadcast %cst_32 : f32 to vector<2x96xf32>
    %202 = arith.addf %201, %200 : vector<2x96xf32>
    %203 = arith.divf %201, %202 : vector<2x96xf32>
    %204 = vector.extract_strided_slice %197 {offsets = [0, 96], sizes = [2, 32], strides = [1, 1]} : vector<2x128xf32> to vector<2x32xf32>
    %205 = math.tanh %204 : vector<2x32xf32>
    %206 = vector.extract_strided_slice %203 {offsets = [0, 32], sizes = [2, 32], strides = [1, 1]} : vector<2x96xf32> to vector<2x32xf32>
    %207 = vector.extract_strided_slice %189 {offsets = [0, 32], sizes = [2, 32], strides = [1, 1]} : vector<2x64xf32> to vector<2x32xf32>
    %208 = arith.mulf %206, %207 : vector<2x32xf32>
    %209 = vector.extract_strided_slice %203 {offsets = [0, 0], sizes = [2, 32], strides = [1, 1]} : vector<2x96xf32> to vector<2x32xf32>
    %210 = arith.mulf %209, %205 : vector<2x32xf32>
    %211 = arith.addf %208, %210 : vector<2x32xf32>
    %212 = vector.extract_strided_slice %203 {offsets = [0, 64], sizes = [2, 32], strides = [1, 1]} : vector<2x96xf32> to vector<2x32xf32>
    %213 = math.tanh %211 : vector<2x32xf32>
    %214 = arith.mulf %212, %213 : vector<2x32xf32>
    %215 = arith.truncf %214 : vector<2x32xf32> to vector<2x32xbf16>
    %c0_33 = arith.constant 0 : index
    %c0_34 = arith.constant 0 : index
    %216 = vector.load %arg7[%c0_33, %c0_34] : memref<32x128xbf16, #tpu.memory_space<vmem>>, vector<32x128xbf16>
    %cst_35 = arith.constant dense<0.000000e+00> : vector<2x128xf32>
    %217 = tpu.matmul %215, %216, %cst_35 {dimension_numbers = #tpu.dot_dimension_numbers<[1], [0], [0], [1], [0, 0, 1, 1], [], []>} : vector<2x32xbf16>, vector<32x128xbf16>, vector<2x128xf32> -> vector<2x128xf32>
    %c0_36 = arith.constant 0 : index
    %c0_37 = arith.constant 0 : index
    %218 = vector.load %arg8[%c0_36, %c0_37] : memref<1x128xf32, #tpu.memory_space<vmem>>, vector<1x128xf32>
    %219 = vector.broadcast %218 : vector<1x128xf32> to vector<2x128xf32>
    %220 = arith.addf %217, %219 : vector<2x128xf32>
    %c0_38 = arith.constant 0 : index
    %c0_39 = arith.constant 0 : index
    %221 = vector.load %arg9[%c0_38, %c0_39] : memref<2x128xf32, #tpu.memory_space<vmem>>, vector<2x128xf32>
    tpu.vector_store %arg9[%c0_38, %c0_39], %220 {strides = array<i32>} : memref<2x128xf32, #tpu.memory_space<vmem>>, vector<2x128xf32>,
    return
  }
  func.func @transform_0(%arg0: i32) -> (i32, i32, i32) {
    %c0_i32 = arith.constant 0 : i32
    %c0_i32_0 = arith.constant 0 : i32
    %c0_i32_1 = arith.constant 0 : i32
    return %c0_i32, %arg0, %c0_i32_0 : i32, i32, i32
  }
  func.func @transform_1(%arg0: i32) -> (i32, i32) {
    %c0_i32 = arith.constant 0 : i32
    %c0_i32_0 = arith.constant 0 : i32
    %c0_i32_1 = arith.constant 0 : i32
    return %c0_i32, %c0_i32_0 : i32, i32
  }
  func.func @transform_2(%arg0: i32) -> (i32, i32) {
    %c0_i32 = arith.constant 0 : i32
    %c0_i32_0 = arith.constant 0 : i32
    %c0_i32_1 = arith.constant 0 : i32
    return %c0_i32, %c0_i32_0 : i32, i32
  }
  func.func @transform_3(%arg0: i32) -> (i32, i32) {
    %c0_i32 = arith.constant 0 : i32
    %c0_i32_0 = arith.constant 0 : i32
    %c0_i32_1 = arith.constant 0 : i32
    return %c0_i32, %c0_i32_0 : i32, i32
  }
  func.func @transform_4(%arg0: i32) -> (i32, i32) {
    %c0_i32 = arith.constant 0 : i32
    %c0_i32_0 = arith.constant 0 : i32
    %c0_i32_1 = arith.constant 0 : i32
    return %c0_i32, %c0_i32_0 : i32, i32
  }
  func.func @transform_5(%arg0: i32) -> (i32, i32) {
    %c0_i32 = arith.constant 0 : i32
    %c0_i32_0 = arith.constant 0 : i32
    %c0_i32_1 = arith.constant 0 : i32
    return %c0_i32, %c0_i32_0 : i32, i32
  }
  func.func @transform_6(%arg0: i32) -> (i32, i32) {
    %c0_i32 = arith.constant 0 : i32
    %c0_i32_0 = arith.constant 0 : i32
    %c0_i32_1 = arith.constant 0 : i32
    return %c0_i32, %c0_i32_0 : i32, i32
  }
  func.func @transform_7(%arg0: i32) -> (i32, i32) {
    %c0_i32 = arith.constant 0 : i32
    %c0_i32_0 = arith.constant 0 : i32
    %c0_i32_1 = arith.constant 0 : i32
    return %c0_i32, %c0_i32_0 : i32, i32
  }
  func.func @transform_8(%arg0: i32) -> (i32, i32) {
    %c0_i32 = arith.constant 0 : i32
    %c0_i32_0 = arith.constant 0 : i32
    return %arg0, %c0_i32 : i32, i32
  }
}

</mosaic_0001>

<bundles_post_ra>
// kernel: stacked_lstm_predictor.1
= control target key start
LH: loop header
LB: loop body
LE: loop exit
PB: predicated region body
PF: predicated region fallthrough
CT: control target
= control target key end

     0   :  { %v90_v1 = vlaneseq  ;;  %v1216_v3 = vmov 0   ;;  %s1516_s0 = inlined_call_operand.vmem [shape: f32[8,2,1], index: 0, kind: input, shape index: {}]   ;;  %s1517_s1 = inlined_call_operand.vmem [shape: f32[1,256], index: 1, kind: input, shape index: {}]   ;;  %s1518_s2 = inlined_call_operand.vmem [shape: f32[1,256], index: 2, kind: input, shape index: {}]   ;;  %s1519_s3 = inlined_call_operand.vmem [shape: bf16[64,256], index: 3, kind: input, shape index: {}]   ;;  %s1520_s4 = inlined_call_operand.vmem [shape: bf16[64,128], index: 4, kind: input, shape index: {}]   ;;  %s1521_s5 = inlined_call_operand.vmem [shape: f32[1,128], index: 5, kind: input, shape index: {}]   ;;  %s1522_s6 = inlined_call_operand.vmem [shape: bf16[32,128], index: 6, kind: input, shape index: {}]   ;;  %s1523_s7 = inlined_call_operand.vmem [shape: f32[1,128], index: 7, kind: input, shape index: {}]   ;;  %s1524_s8 = inlined_call_operand.hbm [shape: f32[2,128], index: 8, kind: output, shape index: {}]  }
   0x1   :  { %v1270_v0 = vld [vmem:[%s1519_s3 + $0x34] ss:$8 sps:$4 sm:$0xff]   ;;  %v1275_v2 = vld [vmem:[%s1519_s3 + $0x30] ss:$8 sps:$4 sm:$0xff]   ;;  %222 = vmatprep.mubr.bf16.mxu0 %v1216_v3  ;;  %1071 = vset.pattern.permute.xlu0 %v1216_v3  ;;  %v1283_v4 = vld [vmem:[%s1519_s3 + $0x24] ss:$8 sps:$4 sm:$0xff]  }
   0x2   :  { %198 = vmatprep.subr.bf16.mxu0 %v1270_v0  ;;  %v91_v5 = vshrl.u32 %v90_v1, 7  ;;  %281 = vmatprep.subr.bf16.mxu1 %v1270_v0  ;;  %v1291_v6 = vld [vmem:[%s1519_s3 + $0x20] ss:$8 sps:$4 sm:$0xff]   ;;  %v1298_v7 = vld [vmem:[%s1519_s3 + $0x14] ss:$8 sps:$4 sm:$0xff]  }
   0x3   :  { %199 = vmatpush1.bf16.msra.mxu0 %v1275_v2  ;;  %282 = vmatpush1.bf16.msra.mxu1 %v1275_v2  ;;  %v1304_v9 = vld [vmem:[%s1519_s3 + $0x10] ss:$8 sps:$4 sm:$0xff]   ;;  %v41_v10 = vld [vmem:[%s1516_s0] sm:$0x3]  ;;  %v1316_v12 = vld [vmem:[%s1519_s3 + $0x4] ss:$8 sps:$4 sm:$0xff]  }
   0x4   :  { %200 = vmatprep.subr.bf16.mxu0 %v1283_v4  ;;  %v92_v8 = vsub.s32 0, %v91_v5  ;;  %283 = vmatprep.subr.bf16.mxu1 %v1283_v4  ;;  %v31_v11 = vld [vmem:[%s1517_s1] sm:$0x3] }
   0x5   :  { %305 = vmatprep.mubr.bf16.mxu1 %v1216_v3  ;;  %51 = vperm.xlu0 %1071, %v41_v10  }
   0x6   :  { %v1318_v13 = vrot.slane %v31_v11, %v92_v8 }
   0x7   :  { %201 = vmatpush1.bf16.msra.mxu0 %v1291_v6  ;;  %284 = vmatpush1.bf16.msra.mxu1 %v1291_v6 }
   0x8   :  { %202 = vmatprep.subr.bf16.mxu0 %v1298_v7  ;;  %285 = vmatprep.subr.bf16.mxu1 %v1298_v7 }
   0x9   :  { %13 = vsyncpa [#allocation3], 0  ;;  %v1328_v14 = vld [vmem:[%s1519_s3] ss:$8 sps:$4 sm:$0xff]   ;;  %v96_v15 = vsub.s32 1, %v91_v5  ;;  %s1217_s25 = smov 64  }
   0xa   :  { %v32_v18 = vld [vmem:[%s1518_s2] sm:$0x3]  ;;  %v42_v28 = vld [vmem:[%s1516_s0 + $0x2] sm:$0x3]  ;;  %v144_v46 = vand.u32 127, %v90_v1  ;;  %vm186_vm1 = vcmask 523264  }
   0xb   :  { %203 = vmatpush1.bf16.msra.mxu0 %v1304_v9  ;;  %286 = vmatpush1.bf16.msra.mxu1 %v1304_v9  ;;  %v1347_v16 = vrot.slane %v31_v11, %v96_v15  ;;  %v1353_v20 = vrot.slane %v32_v18, %v96_v15  ;;  %v1361_v30 = vrot.slane %v32_v18, %v92_v8  ;;  %vm1219_vm2 = vmmov 0   ;;  %s1220_s3 = smov 32   ;;  %s1221_s29 = smov [#allocation2]  }
   0xc   :  { %204 = vmatprep.subr.bf16.mxu0 %v1316_v12  ;;  %287 = vmatprep.subr.bf16.mxu1 %v1316_v12  ;;  %vm145_vm0 = vcmp.lt.s32.totalorder %v144_v46, 32  ;;  %vm936_vm3 = vcmask 261120   ;;  %s987_s30 = sshll.u32 %s1221_s29, 4  ;;  %s988_s30 = int_to_ptr.vmem [resolvable:$true] %s987_s30 }
   0xd   :  { %p1199_p1 = scmp.lt.s32.totalorder %s988_s30, %s988_s30 }
   0xf   :  { %205 = vmatpush1.bf16.msra.mxu0 %v1328_v14  ;;  %288 = vmatpush1.bf16.msra.mxu1 %v1328_v14 }
  0x10   :  { %360 = vmatprep.subr.bf16.mxu0 %v1270_v0  ;;  %435 = vmatprep.subr.bf16.mxu1 %v1270_v0 }
  0x12   :  { %223 = vmatmul.mubr.bf16.vlgmr.msra.gmra.mxu0 %v1216_v3 }
  0x13   :  { %361 = vmatpush1.bf16.msra.mxu0 %v1275_v2  ;;  %384 = vmatprep.mubr.bf16.mxu0 %v1216_v3 }
  0x14   :  { %362 = vmatprep.subr.bf16.mxu0 %v1283_v4 }
  0x17   :  { %363 = vmatpush1.bf16.msra.mxu0 %v1291_v6 }
  0x18   :  { %364 = vmatprep.subr.bf16.mxu0 %v1298_v7 }
  0x1b   :  { %365 = vmatpush1.bf16.msra.mxu0 %v1304_v9 }
  0x1c   :  { %366 = vmatprep.subr.bf16.mxu0 %v1316_v12 }
  0x1f   :  { %367 = vmatpush1.bf16.msra.mxu0 %v1328_v14 }
  0x20   :  { %510 = vmatprep.subr.bf16.mxu0 %v1270_v0 }
  0x80   :  { %v52_v17 = vpop.permute.xlu0 %51 }
  0x81   :  { %v101_v19 = vmul.f32 %v1347_v16, %v52_v17  ;;  %v100_v29 = vmul.f32 %v1318_v13, %v52_v17 }
  0x83   :  { %v128_v21 = vadd.f32 %v1353_v20, %v101_v19  ;;  %v127_v31 = vadd.f32 %v1361_v30, %v100_v29  ;;  %v43_v19 = vld [vmem:[%s1516_s0 + $0x4] sm:$0x3] }
  0xd2   :  { %v224_v22 = vpop.f32.mrf.mxu0 }
  0xd3   :  { %v225_v32 = vadd.f32 %v224_v22, %v127_v31 }
  0xd4   :  { %v226_v23 = vpop.f32.mrf.mxu0 }
  0xd5   :  { %v227_v24 = vadd.f32 %v226_v23, %v128_v21  ;;  %v1003_v33 = vmul.f32 -1.442695, %v225_v32 }
  0xd6   :  { %v228_v25 = vpop.f32.mrf.mxu0 }
  0xd7   :  { %1090 = vtanh.f32 %v227_v24  ;;  %v1004_v43 = vmul.f32 -1.442695, %v227_v24 }
  0xd8   :  { %v229_v26 = vpop.f32.mrf.mxu0  ;;  %1092 = vpow2.f32 %v1003_v33 }
  0xe4   :  { %v1091_v27 = vpop.eup %1090 }
  0xe5   :  { %246 = vrot.lane.b32.xlu0 %v1091_v27, %s1217_s25  ;;  %v1093_v34 = vpop.eup %1092 }
  0xe6   :  { %v237_v35 = vadd.f32 1.0, %v1093_v34 }
  0xe8   :  { %1094 = vrcp.f32 %v237_v35 }
  0xe9   :  { %56 = vperm.xlu0 %1071, %v42_v28  }
  0xf5   :  { %v1095_v36 = vpop.eup %1094 }
  0xf6   :  { %v244_v39 = vmul.f32 0.0, %v1095_v36 }
 0x157   :  { %v247_v37 = vpop.permute.xlu0 %246 }
 0x158   :  { %v249_v38 = vmul.f32 %v1095_v36, %v247_v37 }
 0x15a   :  { %251 = vrot.lane.b32.xlu1 %v249_v38, %s1217_s25 }
 0x164   :  { %v57_v54 = vpop.permute.xlu0 %56 }
 0x165   :  { %v103_v55 = vmul.f32 %v1347_v16, %v57_v54  ;;  %v102_v63 = vmul.f32 %v1318_v13, %v57_v54 }
 0x167   :  { %v130_v57 = vadd.f32 %v1353_v20, %v103_v55  ;;  %v129_v1 = vadd.f32 %v1361_v30, %v102_v63 }
 0x1cc   :  { %v252_v40 = vpop.permute.xlu1 %251 }
 0x1cd   :  { %v254_v41 = vadd.f32 %v252_v40, %v244_v39 }
 0x1cf   :  { %1096 = vtanh.f32 %v254_v41 }
 0x1d0   :  { %1098 = vpow2.f32 %v1004_v43 }
 0x1dc   :  { %v1097_v42 = vpop.eup %1096 }
 0x1dd   :  { %257 = vrot.lane.b32.xlu1 %v1097_v42, %s1217_s25  ;;  %v1099_v44 = vpop.eup %1098 }
 0x1de   :  { %v238_v45 = vadd.f32 1.0, %v1099_v44 }
 0x1e0   :  { %1100 = vrcp.f32 %v238_v45 }
 0x1e1   :  { %264 = vrot.lane.b32.xlu1 %v254_v41, %s1217_s25 }
 0x1ed   :  { %v1101_v47 = vpop.eup %1100 }
 0x24f   :  { %v258_v48 = vpop.permute.xlu1 %257 }
 0x250   :  { %v260_v49 = vmul.f32 %v1101_v47, %v258_v48 }
 0x252   :  { %v268_v50 = vsel %vm145_vm0, %v260_v49, 0.0 }
 0x253   :  { %v269_v51 = vpack.c.bf16 %v268_v50, %v268_v50  ;;  %v265_v52 = vpop.permute.xlu1 %264 }
 0x254   :  { %v267_v53 = vsel %vm145_vm0, %v265_v52, 0.0  ;;  %v44_v52 = vld [vmem:[%s1516_s0 + $0x6] sm:$0x3] }
 0x255   :  { %1005 = vmatmul.mubr.msk.bf16.vlgmr.msra.gmra.mxu1 %vm186_vm1, %v269_v51  ;;  %328 = vrot.lane.b32.xlu1 %v267_v53, %s1217_s25 }
 0x256   :  { %436 = vmatpush1.bf16.msra.mxu1 %v1275_v2  ;;  %459 = vmatprep.mubr.bf16.mxu1 %v1216_v3 }
 0x257   :  { %437 = vmatprep.subr.bf16.mxu1 %v1283_v4 }
 0x25a   :  { %438 = vmatpush1.bf16.msra.mxu1 %v1291_v6 }
 0x25b   :  { %439 = vmatprep.subr.bf16.mxu1 %v1298_v7 }
 0x25e   :  { %440 = vmatpush1.bf16.msra.mxu1 %v1304_v9 }
 0x25f   :  { %441 = vmatprep.subr.bf16.mxu1 %v1316_v12 }
 0x262   :  { %442 = vmatpush1.bf16.msra.mxu1 %v1328_v14 }
 0x263   :  { %585 = vmatprep.subr.bf16.mxu1 %v1270_v0 }
 0x2c7   :  { %v329_v21 = vpop.permute.xlu1 %328 }
 0x315   :  { %v307_v56 = vpop.f32.mrf.mxu1 }
 0x316   :  { %v308_v5 = vadd.f32 %v307_v56, %v129_v1 }
 0x317   :  { %v309_v58 = vpop.f32.mrf.mxu1 }
 0x318   :  { %v310_v59 = vadd.f32 %v309_v58, %v130_v57  ;;  %v1006_v8 = vmul.f32 -1.442695, %v308_v5 }
 0x319   :  { %v311_v60 = vpop.f32.mrf.mxu1 }
 0x31a   :  { %1102 = vtanh.f32 %v310_v59  ;;  %v1007_v26 = vmul.f32 -1.442695, %v310_v59 }
 0x31b   :  { %v312_v61 = vpop.f32.mrf.mxu1  ;;  %1104 = vpow2.f32 %v1006_v8 }
 0x327   :  { %v1103_v62 = vpop.eup %1102 }
 0x328   :  { %333 = vrot.lane.b32.xlu0 %v1103_v62, %s1217_s25  ;;  %v1105_v10 = vpop.eup %1104 }
 0x329   :  { %v320_v11 = vadd.f32 1.0, %v1105_v10 }
 0x32b   :  { %1106 = vrcp.f32 %v320_v11 }
 0x338   :  { %v1107_v15 = vpop.eup %1106 }
 0x339   :  { %v331_v22 = vmul.f32 %v1107_v15, %v329_v21 }
 0x39a   :  { %v334_v17 = vpop.permute.xlu0 %333 }
 0x39b   :  { %v336_v18 = vmul.f32 %v1107_v15, %v334_v17 }
 0x39d   :  { %338 = vrot.lane.b32.xlu0 %v336_v18, %s1217_s25 }
 0x3a1   :  { %61 = vperm.xlu0 %1071, %v43_v19  }
 0x40f   :  { %v339_v23 = vpop.permute.xlu0 %338 }
 0x410   :  { %v341_v24 = vadd.f32 %v339_v23, %v331_v22 }
 0x412   :  { %1108 = vtanh.f32 %v341_v24 }
 0x413   :  { %1110 = vpow2.f32 %v1007_v26 }
 0x41c   :  { %v62_v34 = vpop.permute.xlu0 %61 }
 0x41d   :  { %v105_v35 = vmul.f32 %v1347_v16, %v62_v34  ;;  %v104_v43 = vmul.f32 %v1318_v13, %v62_v34 }
 0x41f   :  { %v1109_v25 = vpop.eup %1108  ;;  %v132_v37 = vadd.f32 %v1353_v20, %v105_v35  ;;  %v131_v44 = vadd.f32 %v1361_v30, %v104_v43 }
 0x420   :  { %344 = vrot.lane.b32.xlu1 %v1109_v25, %s1217_s25  ;;  %v1111_v27 = vpop.eup %1110 }
 0x421   :  { %v321_v28 = vadd.f32 1.0, %v1111_v27 }
 0x423   :  { %1112 = vrcp.f32 %v321_v28 }
 0x430   :  { %v1113_v29 = vpop.eup %1112 }
 0x492   :  { %v345_v31 = vpop.permute.xlu1 %344 }
 0x493   :  { %v347_v32 = vmul.f32 %v1113_v29, %v345_v31  ;;  %v45_v29 = vld [vmem:[%s1516_s0 + $0x8] sm:$0x3] }
 0x495   :  { %v348_v33 = vpack.c.bf16 %v347_v32, %v347_v32 }
 0x497   :  { %1008 = vmatmul.mubr.msk.bf16.vlgmr.msra.gmra.mxu0 %vm186_vm1, %v348_v33 }
 0x498   :  { %511 = vmatpush1.bf16.msra.mxu0 %v1275_v2  ;;  %534 = vmatprep.mubr.bf16.mxu0 %v1216_v3 }
 0x499   :  { %512 = vmatprep.subr.bf16.mxu0 %v1283_v4 }
 0x49c   :  { %513 = vmatpush1.bf16.msra.mxu0 %v1291_v6 }
 0x49d   :  { %514 = vmatprep.subr.bf16.mxu0 %v1298_v7 }
 0x4a0   :  { %515 = vmatpush1.bf16.msra.mxu0 %v1304_v9 }
 0x4a1   :  { %516 = vmatprep.subr.bf16.mxu0 %v1316_v12 }
 0x4a4   :  { %517 = vmatpush1.bf16.msra.mxu0 %v1328_v14 }
 0x4a5   :  { %660 = vmatprep.subr.bf16.mxu0 %v1270_v0 }
 0x557   :  { %v386_v36 = vpop.f32.mrf.mxu0 }
 0x558   :  { %v387_v45 = vadd.f32 %v386_v36, %v131_v44 }
 0x559   :  { %v388_v38 = vpop.f32.mrf.mxu0 }
 0x55a   :  { %v389_v39 = vadd.f32 %v388_v38, %v132_v37  ;;  %v1009_v46 = vmul.f32 -1.442695, %v387_v45 }
 0x55b   :  { %v390_v40 = vpop.f32.mrf.mxu0 }
 0x55c   :  { %1114 = vtanh.f32 %v389_v39  ;;  %v1010_v57 = vmul.f32 -1.442695, %v389_v39 }
 0x55d   :  { %v391_v41 = vpop.f32.mrf.mxu0  ;;  %1116 = vpow2.f32 %v1009_v46 }
 0x569   :  { %v1115_v42 = vpop.eup %1114 }
 0x56a   :  { %408 = vrot.lane.b32.xlu1 %v1115_v42, %s1217_s25  ;;  %v1117_v47 = vpop.eup %1116 }
 0x56b   :  { %v399_v48 = vadd.f32 1.0, %v1117_v47 }
 0x56d   :  { %1118 = vrcp.f32 %v399_v48 }
 0x57a   :  { %v1119_v49 = vpop.eup %1118 }
 0x57b   :  { %v406_v53 = vmul.f32 %v1119_v49, %v341_v24 }
 0x5dc   :  { %v409_v50 = vpop.permute.xlu1 %408 }
 0x5dd   :  { %v411_v51 = vmul.f32 %v1119_v49, %v409_v50 }
 0x5df   :  { %413 = vrot.lane.b32.xlu0 %v411_v51, %s1217_s25 }
 0x5e3   :  { %66 = vperm.xlu0 %1071, %v44_v52  }
 0x651   :  { %v414_v54 = vpop.permute.xlu0 %413 }
 0x652   :  { %v416_v55 = vadd.f32 %v414_v54, %v406_v53 }
 0x654   :  { %1120 = vtanh.f32 %v416_v55 }
 0x655   :  { %1122 = vpow2.f32 %v1010_v57 }
 0x65e   :  { %v67_v1 = vpop.permute.xlu0 %66 }
 0x65f   :  { %v107_v5 = vmul.f32 %v1347_v16, %v67_v1  ;;  %v106_v21 = vmul.f32 %v1318_v13, %v67_v1 }
 0x661   :  { %v1121_v56 = vpop.eup %1120  ;;  %v134_v10 = vadd.f32 %v1353_v20, %v107_v5  ;;  %v133_v22 = vadd.f32 %v1361_v30, %v106_v21 }
 0x662   :  { %419 = vrot.lane.b32.xlu1 %v1121_v56, %s1217_s25  ;;  %v1123_v58 = vpop.eup %1122 }
 0x663   :  { %v400_v59 = vadd.f32 1.0, %v1123_v58 }
 0x665   :  { %1124 = vrcp.f32 %v400_v59 }
 0x672   :  { %v1125_v60 = vpop.eup %1124 }
 0x6d4   :  { %v420_v61 = vpop.permute.xlu1 %419 }
 0x6d5   :  { %v422_v62 = vmul.f32 %v1125_v60, %v420_v61  ;;  %v46_v60 = vld [vmem:[%s1516_s0 + $0xa] sm:$0x3] }
 0x6d7   :  { %v423_v63 = vpack.c.bf16 %v422_v62, %v422_v62 }
 0x6d9   :  { %1011 = vmatmul.mubr.msk.bf16.vlgmr.msra.gmra.mxu1 %vm186_vm1, %v423_v63 }
 0x6da   :  { %586 = vmatpush1.bf16.msra.mxu1 %v1275_v2  ;;  %609 = vmatprep.mubr.bf16.mxu1 %v1216_v3 }
 0x6db   :  { %587 = vmatprep.subr.bf16.mxu1 %v1283_v4 }
 0x6de   :  { %588 = vmatpush1.bf16.msra.mxu1 %v1291_v6 }
 0x6df   :  { %589 = vmatprep.subr.bf16.mxu1 %v1298_v7 }
 0x6e2   :  { %590 = vmatpush1.bf16.msra.mxu1 %v1304_v9 }
 0x6e3   :  { %591 = vmatprep.subr.bf16.mxu1 %v1316_v12 }
 0x6e6   :  { %592 = vmatpush1.bf16.msra.mxu1 %v1328_v14 }
 0x6e7   :  { %735 = vmatprep.subr.bf16.mxu1 %v1270_v0 }
 0x799   :  { %v461_v8 = vpop.f32.mrf.mxu1 }
 0x79a   :  { %v462_v23 = vadd.f32 %v461_v8, %v133_v22 }
 0x79b   :  { %v463_v11 = vpop.f32.mrf.mxu1 }
 0x79c   :  { %v464_v15 = vadd.f32 %v463_v11, %v134_v10  ;;  %v1012_v0 = vmul.f32 -1.442695, %v462_v23 }
 0x79d   :  { %v465_v17 = vpop.f32.mrf.mxu1 }
 0x79e   :  { %1126 = vtanh.f32 %v464_v15  ;;  %v1013_v35 = vmul.f32 -1.442695, %v464_v15 }
 0x79f   :  { %v466_v18 = vpop.f32.mrf.mxu1  ;;  %1128 = vpow2.f32 %v1012_v0 }
 0x7ab   :  { %v1127_v19 = vpop.eup %1126 }
 0x7ac   :  { %483 = vrot.lane.b32.xlu1 %v1127_v19, %s1217_s25  ;;  %v1129_v24 = vpop.eup %1128 }
 0x7ad   :  { %v474_v25 = vadd.f32 1.0, %v1129_v24 }
 0x7af   :  { %1130 = vrcp.f32 %v474_v25 }
 0x7bc   :  { %v1131_v26 = vpop.eup %1130 }
 0x7bd   :  { %v481_v31 = vmul.f32 %v1131_v26, %v416_v55 }
 0x81e   :  { %v484_v27 = vpop.permute.xlu1 %483 }
 0x81f   :  { %v486_v28 = vmul.f32 %v1131_v26, %v484_v27 }
 0x821   :  { %488 = vrot.lane.b32.xlu0 %v486_v28, %s1217_s25 }
 0x825   :  { %71 = vperm.xlu0 %1071, %v45_v29   ;;  %v47_v29 = vld [vmem:[%s1516_s0 + $0xc] sm:$0x3] }
 0x893   :  { %v489_v32 = vpop.permute.xlu0 %488 }
 0x894   :  { %v491_v33 = vadd.f32 %v489_v32, %v481_v31 }
 0x896   :  { %1132 = vtanh.f32 %v491_v33 }
 0x897   :  { %1134 = vpow2.f32 %v1013_v35 }
 0x8a0   :  { %v72_v42 = vpop.permute.xlu0 %71 }
 0x8a1   :  { %v109_v43 = vmul.f32 %v1347_v16, %v72_v42  ;;  %v108_v51 = vmul.f32 %v1318_v13, %v72_v42 }
 0x8a3   :  { %v1133_v34 = vpop.eup %1132  ;;  %v136_v45 = vadd.f32 %v1353_v20, %v109_v43  ;;  %v135_v52 = vadd.f32 %v1361_v30, %v108_v51 }
 0x8a4   :  { %494 = vrot.lane.b32.xlu1 %v1133_v34, %s1217_s25  ;;  %v1135_v36 = vpop.eup %1134 }
 0x8a5   :  { %v475_v37 = vadd.f32 1.0, %v1135_v36 }
 0x8a7   :  { %1136 = vrcp.f32 %v475_v37 }
 0x8b4   :  { %v1137_v38 = vpop.eup %1136 }
 0x916   :  { %v495_v39 = vpop.permute.xlu1 %494 }
 0x917   :  { %v497_v40 = vmul.f32 %v1137_v38, %v495_v39 }
 0x919   :  { %v498_v41 = vpack.c.bf16 %v497_v40, %v497_v40 }
 0x91b   :  { %1014 = vmatmul.mubr.msk.bf16.vlgmr.msra.gmra.mxu0 %vm186_vm1, %v498_v41 }
 0x91c   :  { %661 = vmatpush1.bf16.msra.mxu0 %v1275_v2  ;;  %684 = vmatprep.mubr.bf16.mxu0 %v1216_v3 }
 0x91d   :  { %662 = vmatprep.subr.bf16.mxu0 %v1283_v4 }
 0x920   :  { %663 = vmatpush1.bf16.msra.mxu0 %v1291_v6 }
 0x921   :  { %664 = vmatprep.subr.bf16.mxu0 %v1298_v7 }
 0x924   :  { %665 = vmatpush1.bf16.msra.mxu0 %v1304_v9 }
 0x925   :  { %666 = vmatprep.subr.bf16.mxu0 %v1316_v12 }
 0x928   :  { %667 = vmatpush1.bf16.msra.mxu0 %v1328_v14 }
 0x9db   :  { %v536_v44 = vpop.f32.mrf.mxu0 }
 0x9dc   :  { %v537_v53 = vadd.f32 %v536_v44, %v135_v52 }
 0x9dd   :  { %v538_v46 = vpop.f32.mrf.mxu0 }
 0x9de   :  { %v539_v47 = vadd.f32 %v538_v46, %v136_v45  ;;  %v1015_v54 = vmul.f32 -1.442695, %v537_v53 }
 0x9df   :  { %v540_v48 = vpop.f32.mrf.mxu0 }
 0x9e0   :  { %1138 = vtanh.f32 %v539_v47  ;;  %v1016_v5 = vmul.f32 -1.442695, %v539_v47 }
 0x9e1   :  { %v541_v49 = vpop.f32.mrf.mxu0  ;;  %1140 = vpow2.f32 %v1015_v54 }
 0x9ed   :  { %v1139_v50 = vpop.eup %1138 }
 0x9ee   :  { %558 = vrot.lane.b32.xlu1 %v1139_v50, %s1217_s25  ;;  %v1141_v55 = vpop.eup %1140 }
 0x9ef   :  { %v549_v56 = vadd.f32 1.0, %v1141_v55 }
 0x9f1   :  { %1142 = vrcp.f32 %v549_v56 }
 0x9fe   :  { %v1143_v57 = vpop.eup %1142 }
 0x9ff   :  { %v556_v61 = vmul.f32 %v1143_v57, %v491_v33 }
 0xa60   :  { %v559_v58 = vpop.permute.xlu1 %558 }
 0xa61   :  { %v561_v59 = vmul.f32 %v1143_v57, %v559_v58 }
 0xa63   :  { %563 = vrot.lane.b32.xlu0 %v561_v59, %s1217_s25 }
 0xa67   :  { %76 = vperm.xlu0 %1071, %v46_v60   ;;  %v48_v60 = vld [vmem:[%s1516_s0 + $0xe] sm:$0x3] }
 0xad5   :  { %v564_v62 = vpop.permute.xlu0 %563 }
 0xad6   :  { %v566_v63 = vadd.f32 %v564_v62, %v556_v61 }
 0xad8   :  { %1144 = vtanh.f32 %v566_v63 }
 0xad9   :  { %1146 = vpow2.f32 %v1016_v5 }
 0xae2   :  { %v77_v19 = vpop.permute.xlu0 %76 }
 0xae3   :  { %v111_v21 = vmul.f32 %v1347_v16, %v77_v19 }
 0xae5   :  { %v1145_v1 = vpop.eup %1144 }
 0xae6   :  { %569 = vrot.lane.b32.xlu1 %v1145_v1, %s1217_s25  ;;  %v1147_v8 = vpop.eup %1146 }
 0xae7   :  { %v550_v10 = vadd.f32 1.0, %v1147_v8 }
 0xae9   :  { %1148 = vrcp.f32 %v550_v10 }
 0xaf6   :  { %v1149_v11 = vpop.eup %1148 }
 0xb58   :  { %v570_v15 = vpop.permute.xlu1 %569 }
 0xb59   :  { %v572_v17 = vmul.f32 %v1149_v11, %v570_v15 }
 0xb5b   :  { %v573_v18 = vpack.c.bf16 %v572_v17, %v572_v17 }
 0xb5d   :  { %1017 = vmatmul.mubr.msk.bf16.vlgmr.msra.gmra.mxu1 %vm186_vm1, %v573_v18 }
 0xb5e   :  { %736 = vmatpush1.bf16.msra.mxu1 %v1275_v2  ;;  %759 = vmatprep.mubr.bf16.mxu1 %v1216_v3  ;;  %v138_v2 = vadd.f32 %v1353_v20, %v111_v21 }
 0xb5f   :  { %737 = vmatprep.subr.bf16.mxu1 %v1283_v4 }
 0xb62   :  { %738 = vmatpush1.bf16.msra.mxu1 %v1291_v6 }
 0xb63   :  { %739 = vmatprep.subr.bf16.mxu1 %v1298_v7  ;;  %v110_v7 = vmul.f32 %v1318_v13, %v77_v19 }
 0xb66   :  { %740 = vmatpush1.bf16.msra.mxu1 %v1304_v9  ;;  %v137_v9 = vadd.f32 %v1361_v30, %v110_v7 }
 0xb67   :  { %741 = vmatprep.subr.bf16.mxu1 %v1316_v12 }
 0xb6a   :  { %742 = vmatpush1.bf16.msra.mxu1 %v1328_v14 }
 0xc1d   :  { %v611_v22 = vpop.f32.mrf.mxu1 }
 0xc1e   :  { %v612_v12 = vadd.f32 %v611_v22, %v137_v9 }
 0xc1f   :  { %v613_v23 = vpop.f32.mrf.mxu1 }
 0xc20   :  { %v614_v3 = vadd.f32 %v613_v23, %v138_v2  ;;  %v1018_v14 = vmul.f32 -1.442695, %v612_v12 }
 0xc21   :  { %v615_v0 = vpop.f32.mrf.mxu1 }
 0xc22   :  { %1150 = vtanh.f32 %v614_v3  ;;  %v1019_v35 = vmul.f32 -1.442695, %v614_v3 }
 0xc23   :  { %v616_v4 = vpop.f32.mrf.mxu1  ;;  %1152 = vpow2.f32 %v1018_v14 }
 0xc2f   :  { %v1151_v6 = vpop.eup %1150 }
 0xc30   :  { %633 = vrot.lane.b32.xlu1 %v1151_v6, %s1217_s25  ;;  %v1153_v24 = vpop.eup %1152 }
 0xc31   :  { %v624_v25 = vadd.f32 1.0, %v1153_v24 }
 0xc33   :  { %1154 = vrcp.f32 %v624_v25 }
 0xc40   :  { %v1155_v26 = vpop.eup %1154 }
 0xc41   :  { %v631_v31 = vmul.f32 %v1155_v26, %v566_v63 }
 0xca2   :  { %v634_v27 = vpop.permute.xlu1 %633 }
 0xca3   :  { %v636_v28 = vmul.f32 %v1155_v26, %v634_v27  ;;  %v1084_v27 = vld [vmem:[%s1520_s4 + $0x18] sm:$0xff]  }
 0xca5   :  { %638 = vrot.lane.b32.xlu0 %v636_v28, %s1217_s25  ;;  %v1218_v28 = vmov 0.0  }
 0xca6   :  { %1045 = vmatprep.subr.bf16.mxu0 %v1218_v28  ;;  %1057 = vmatprep.subr.bf16.mxu1 %v1218_v28 }
 0xca9   :  { %81 = vperm.xlu0 %1071, %v47_v29  }
 0xd17   :  { %v639_v32 = vpop.permute.xlu0 %638 }
 0xd18   :  { %v641_v33 = vadd.f32 %v639_v32, %v631_v31 }
 0xd1a   :  { %1156 = vtanh.f32 %v641_v33 }
 0xd1b   :  { %1158 = vpow2.f32 %v1019_v35 }
 0xd24   :  { %v82_v42 = vpop.permute.xlu0 %81 }
 0xd25   :  { %v113_v43 = vmul.f32 %v1347_v16, %v82_v42  ;;  %v112_v51 = vmul.f32 %v1318_v13, %v82_v42  ;;  %v1026_v42 = vld [vmem:[%s1521_s5] ss:$0 sm:$0xff] }
 0xd27   :  { %v1157_v34 = vpop.eup %1156  ;;  %v140_v45 = vadd.f32 %v1353_v20, %v113_v43  ;;  %v139_v52 = vadd.f32 %v1361_v30, %v112_v51 }
 0xd28   :  { %644 = vrot.lane.b32.xlu1 %v1157_v34, %s1217_s25  ;;  %v1159_v36 = vpop.eup %1158 }
 0xd29   :  { %v625_v37 = vadd.f32 1.0, %v1159_v36 }
 0xd2b   :  { %1160 = vrcp.f32 %v625_v37 }
 0xd38   :  { %v1161_v38 = vpop.eup %1160 }
 0xd9a   :  { %v645_v39 = vpop.permute.xlu1 %644 }
 0xd9b   :  { %v647_v40 = vmul.f32 %v1161_v38, %v645_v39 }
 0xd9d   :  { %v648_v41 = vpack.c.bf16 %v647_v40, %v647_v40 }
 0xd9f   :  { %1020 = vmatmul.mubr.msk.bf16.vlgmr.msra.gmra.mxu0 %vm186_vm1, %v648_v41 }
 0xda0   :  { %1046 = vmatpush3.bf16.msra.mxu0 %v1084_v27  ;;  %1053 = vmatprep.mubr.msk.bf16.mxu0 %vm1219_vm2, %v1218_v28 }
 0xda1   :  { %1047 = vmatprep.subr.bf16.mxu0 %v1218_v28 }
 0xe5f   :  { %v686_v44 = vpop.f32.mrf.mxu0 }
 0xe60   :  { %v687_v53 = vadd.f32 %v686_v44, %v139_v52 }
 0xe61   :  { %v688_v46 = vpop.f32.mrf.mxu0 }
 0xe62   :  { %v689_v47 = vadd.f32 %v688_v46, %v140_v45  ;;  %v1021_v54 = vmul.f32 -1.442695, %v687_v53 }
 0xe63   :  { %v690_v48 = vpop.f32.mrf.mxu0 }
 0xe64   :  { %1162 = vtanh.f32 %v689_v47  ;;  %v1022_v5 = vmul.f32 -1.442695, %v689_v47 }
 0xe65   :  { %v691_v49 = vpop.f32.mrf.mxu0  ;;  %1164 = vpow2.f32 %v1021_v54 }
 0xe71   :  { %v1163_v50 = vpop.eup %1162 }
 0xe72   :  { %708 = vrot.lane.b32.xlu1 %v1163_v50, %s1217_s25  ;;  %v1165_v55 = vpop.eup %1164 }
 0xe73   :  { %v699_v56 = vadd.f32 1.0, %v1165_v55 }
 0xe75   :  { %1166 = vrcp.f32 %v699_v56 }
 0xe82   :  { %v1167_v57 = vpop.eup %1166 }
 0xe83   :  { %v706_v61 = vmul.f32 %v1167_v57, %v641_v33  ;;  %v1087_v33 = vld [vmem:[%s1520_s4] sm:$0xff]  }
 0xee4   :  { %v709_v58 = vpop.permute.xlu1 %708 }
 0xee5   :  { %v711_v59 = vmul.f32 %v1167_v57, %v709_v58 }
 0xee7   :  { %713 = vrot.lane.b32.xlu0 %v711_v59, %s1217_s25  ;;  %v1088_v59 = vld [vmem:[%s1522_s6 + $0x8] sm:$0xff]  }
 0xeeb   :  { %86 = vperm.xlu0 %1071, %v48_v60   ;;  %v1089_v60 = vld [vmem:[%s1522_s6] sm:$0xff]   ;;  %s1194_s6 = scalar_lea.vmem %s988_s30, 32 }
 0xeec   :  { %p1195_p0 = scmp.ne.s32.totalorder %s988_s30, %s1194_s6  ;;  %p1200_p2 = scmp.lt.s32.totalorder %s1194_s6, %s1194_s6 }
 0xeee   :  { %p1201_p3 = por %p1200_p2, %p1199_p1 }
 0xef0   :  { %p1202_p4 = pnand %p1201_p3, %p1195_p0 }
 0xf59   :  { %v714_v62 = vpop.permute.xlu0 %713 }
 0xf5a   :  { %v716_v63 = vadd.f32 %v714_v62, %v706_v61 }
 0xf5c   :  { %1168 = vtanh.f32 %v716_v63 }
 0xf5d   :  { %1170 = vpow2.f32 %v1022_v5 }
 0xf66   :  { %v87_v19 = vpop.permute.xlu0 %86 }
 0xf67   :  { %v115_v21 = vmul.f32 %v1347_v16, %v87_v19  ;;  %v114_v7 = vmul.f32 %v1318_v13, %v87_v19  ;;  %v1085_v13 = vld [vmem:[%s1520_s4 + $0x10] sm:$0xff]  }
 0xf68   :  { %1048 = vmatpush3.bf16.msra.mxu0 %v1085_v13 }
 0xf69   :  { %v1169_v1 = vpop.eup %1168  ;;  %v142_v2 = vadd.f32 %v1353_v20, %v115_v21  ;;  %v141_v9 = vadd.f32 %v1361_v30, %v114_v7  ;;  %v1086_v30 = vld [vmem:[%s1520_s4 + $0x8] sm:$0xff]   ;;  %1049 = vmatprep.subr.bf16.mxu0 %v1218_v28 }
 0xf6a   :  { %719 = vrot.lane.b32.xlu1 %v1169_v1, %s1217_s25  ;;  %v1171_v8 = vpop.eup %1170 }
 0xf6b   :  { %v700_v10 = vadd.f32 1.0, %v1171_v8  ;;  %v1033_v8 = vld [vmem:[%s1523_s7] ss:$0 sm:$0xff] }
 0xf6c   :  { %1050 = vmatpush3.bf16.msra.mxu0 %v1086_v30 }
 0xf6d   :  { %1172 = vrcp.f32 %v700_v10  ;;  %1051 = vmatprep.subr.bf16.mxu0 %v1218_v28 }
 0xf70   :  { %1052 = vmatpush3.bf16.msra.mxu0 %v1087_v33 }
 0xf7a   :  { %v1173_v11 = vpop.eup %1172 }
 0xfdc   :  { %v720_v15 = vpop.permute.xlu1 %719 }
 0xfdd   :  { %v722_v17 = vmul.f32 %v1173_v11, %v720_v15 }
 0xfdf   :  { %v723_v18 = vpack.c.bf16 %v722_v17, %v722_v17 }
 0xfe1   :  { %1023 = vmatmul.mubr.msk.bf16.vlgmr.msra.gmra.mxu1 %vm186_vm1, %v723_v18 }
 0xfe2   :  { %1061 = vmatprep.mubr.msk.bf16.mxu1 %vm1219_vm2, %v1218_v28  ;;  %1058 = vmatpush3.bf16.msra.mxu1 %v1088_v59 }
 0xfe3   :  { %1059 = vmatprep.subr.bf16.mxu1 %v1218_v28 }
 0xfe6   :  { %1060 = vmatpush3.bf16.msra.mxu1 %v1089_v60 }
0x10a1   :  { %v761_v22 = vpop.f32.mrf.mxu1 }
0x10a2   :  { %v762_v12 = vadd.f32 %v761_v22, %v141_v9 }
0x10a3   :  { %v763_v23 = vpop.f32.mrf.mxu1 }
0x10a4   :  { %v764_v3 = vadd.f32 %v763_v23, %v142_v2  ;;  %v1024_v14 = vmul.f32 -1.442695, %v762_v12 }
0x10a5   :  { %v765_v0 = vpop.f32.mrf.mxu1 }
0x10a6   :  { %1174 = vtanh.f32 %v764_v3  ;;  %v1025_v35 = vmul.f32 -1.442695, %v764_v3 }
0x10a7   :  { %v766_v4 = vpop.f32.mrf.mxu1  ;;  %1176 = vpow2.f32 %v1024_v14 }
0x10b3   :  { %v1175_v6 = vpop.eup %1174 }
0x10b4   :  { %783 = vrot.lane.b32.xlu1 %v1175_v6, %s1217_s25  ;;  %v1177_v24 = vpop.eup %1176 }
0x10b5   :  { %v774_v16 = vadd.f32 1.0, %v1177_v24 }
0x10b7   :  { %1178 = vrcp.f32 %v774_v16 }
0x10c4   :  { %v1179_v25 = vpop.eup %1178 }
0x10c5   :  { %v781_v29 = vmul.f32 %v1179_v25, %v716_v63 }
0x1126   :  { %v784_v20 = vpop.permute.xlu1 %783 }
0x1127   :  { %v786_v26 = vmul.f32 %v1179_v25, %v784_v20 }
0x1129   :  { %788 = vrot.lane.b32.xlu0 %v786_v26, %s1217_s25 }
0x119b   :  { %v789_v31 = vpop.permute.xlu0 %788 }
0x119c   :  { %v791_v32 = vadd.f32 %v789_v31, %v781_v29 }
0x119e   :  { %1180 = vtanh.f32 %v791_v32 }
0x119f   :  { %1182 = vpow2.f32 %v1025_v35 }
0x11ab   :  { %v1181_v34 = vpop.eup %1180 }
0x11ac   :  { %794 = vrot.lane.b32.xlu1 %v1181_v34, %s1217_s25  ;;  %v1183_v36 = vpop.eup %1182 }
0x11ad   :  { %v775_v37 = vadd.f32 1.0, %v1183_v36 }
0x11af   :  { %1184 = vrcp.f32 %v775_v37 }
0x11b0   :  { %889 = vrot.lane.b32.xlu1 %v791_v32, %s1217_s25 }
0x11bc   :  { %v1185_v38 = vpop.eup %1184 }
0x121e   :  { %v795_v39 = vpop.permute.xlu1 %794 }
0x121f   :  { %v797_v40 = vmul.f32 %v1185_v38, %v795_v39 }
0x1221   :  { %v798_v41 = vpack.c.bf16 %v797_v40, %v797_v40 }
0x1222   :  { %v890_v55 = vpop.permute.xlu1 %889 }
0x1223   :  { %1054 = vmatmul.mubr.msk.bf16.vlgmr.msra.gmra.mxu0 %vm186_vm1, %v798_v41 }
0x12e3   :  { %v875_v43 = vpop.f32.mrf.mxu0 }
0x12e4   :  { %v876_v44 = vadd.f32 %v1026_v42, %v875_v43 }
0x12e5   :  { %v1055_v45 = vpop.f32.mrf.mxu0 }
0x12e6   :  { %1186 = vtanh.f32 %v876_v44  ;;  %v1032_v49 = vmul.f32 -1.442695, %v876_v44 }
0x12e7   :  { %v878_v46 = vpop.f32.mrf.mxu0 }
0x12e8   :  { %1188 = vpow2.f32 %v1032_v49 }
0x12e9   :  { %v1056_v47 = vpop.f32.mrf.mxu0 }
0x12f3   :  { %v1187_v48 = vpop.eup %1186 }
0x12f4   :  { %894 = vrot.lane.b32.xlu0 %v1187_v48, %s1220_s3 }
0x12f5   :  { %v1189_v50 = vpop.eup %1188 }
0x12f6   :  { %v884_v51 = vadd.f32 1.0, %v1189_v50 }
0x12f8   :  { %1190 = vrcp.f32 %v884_v51 }
0x1305   :  { %v1191_v52 = vpop.eup %1190 }
0x1306   :  { %v892_v56 = vmul.f32 %v1191_v52, %v890_v55 }
0x1366   :  { %v895_v53 = vpop.permute.xlu0 %894 }
0x1367   :  { %v897_v54 = vmul.f32 %v1191_v52, %v895_v53 }
0x1369   :  { %899 = vrot.lane.b32.xlu0 %v897_v54, %s1220_s3 }
0x13db   :  { %v900_v57 = vpop.permute.xlu0 %899 }
0x13dc   :  { %v902_v58 = vadd.f32 %v900_v57, %v892_v56 }
0x13de   :  { %1192 = vtanh.f32 %v902_v58 }
0x13eb   :  { %v1193_v61 = vpop.eup %1192 }
0x13ec   :  { %905 = vrot.lane.b32.xlu1 %v1193_v61, %s1220_s3 }
0x145e   :  { %v906_v62 = vpop.permute.xlu1 %905 }
0x145f   :  { %v908_v63 = vmul.f32 %v1191_v52, %v906_v62 }
0x1461   :  { %v909_v1 = vpack.c.bf16 %v908_v63, %v908_v63 }
0x1463   :  { %922 = vrot.lane.b32.xlu0 %v909_v1, %s1217_s25 }
0x14d5   :  { %v923_v5 = vpop.permute.xlu0 %922 }
0x14d6   :  { %1062 = vmatmul.mubr.msk.bf16.vlgmr.msra.gmra.mxu1 %vm936_vm3, %v923_v5 }
0x1596   :  { %v974_v10 = vpop.f32.mrf.mxu1 }
0x1597   :  { %v975_v11 = vadd.f32 %v1033_v8, %v974_v10 }
0x1598   :  { %v1063_v15 = vpop.f32.mrf.mxu1 }
0x1599   :  { %980 = vst [vmem:[#allocation2] sm:$0x3] %v975_v11 }
0x159a   :  { %v977_v17 = vpop.f32.mrf.mxu1 }
0x159b   :  { %1205 = shalt.err (!%p1202_p4)
}
0x159c   :  { %990 = dma.vmem_to_hbm [thread:$0]  %s988_s30, 32, %s1524_s8, [#allocation3]   ;;  %v1064_v18 = vpop.f32.mrf.mxu1 }
0x159d   :  { %1214 = dma.done.wait [#allocation3], 32  }
0x159e   :  { %1215 = vsyncadd [#allocation3], 4294967264 }
0x159f   :  { %994 = vsyncpa [#allocation3], 1 }

</bundles_post_ra>
